<compile_context>
chip_gen: v5e
topology: v5e:2x2
jax: 0.10.0
libtpu: 0.0.40
codegen_flags: <defaults>
</compile_context>

<pallas_src>
import functools
import math

import jax
import jax.numpy as jnp
from jax.experimental import pallas as pl
from jax.experimental.pallas import tpu as pltpu

LN_EPS = 1e-5


def _round_up(n, m):
    return ((n + m - 1) // m) * m


def _gelu_exact(x):
    # nn.GELU() default = exact erf-based GELU.
    return 0.5 * x * (1.0 + jax.lax.erf(x * (1.0 / math.sqrt(2.0))))


def res_norm_kernel(x_ref, w1_ref, w2_ref, vec_ref, out_ref, *, d_valid):
    """One (TM, Dp) row tile of fused Linear->GELU->LN x2 + residual."""
    dp = x_ref.shape[-1]

    # Packed param vectors: rows 0..5 = b1, g1, beta1, b2, g2, beta2 (f32).
    vecs = vec_ref[...]
    b1, g1, be1 = vecs[0:1], vecs[1:2], vecs[2:3]
    b2, g2, be2 = vecs[3:4], vecs[4:5], vecs[5:6]

    if d_valid != dp:
        lane = jax.lax.broadcasted_iota(jnp.int32, (1, dp), 1)
        mask = (lane < d_valid).astype(jnp.float32)
    else:
        mask = None
    inv_d = 1.0 / float(d_valid)

    def layernorm(v, gamma, beta):
        # Statistics over the true (unpadded) hidden size. Padded lanes carry
        # exact zeros and have gamma=beta=0, so they stay zero on output.
        if mask is None:
            mean = jnp.sum(v, axis=-1, keepdims=True) * inv_d
            vc = v - mean
            var = jnp.sum(vc * vc, axis=-1, keepdims=True) * inv_d
        else:
            mean = jnp.sum(v * mask, axis=-1, keepdims=True) * inv_d
            vc = v - mean
            var = jnp.sum(vc * vc * mask, axis=-1, keepdims=True) * inv_d
        return vc * jax.lax.rsqrt(var + LN_EPS) * gamma + beta

    # ---- block 1: Linear -> GELU -> LayerNorm (bf16 MXU operands, f32 acc) ----
    y = jnp.dot(x_ref[...].astype(jnp.bfloat16), w1_ref[...],
                preferred_element_type=jnp.float32) + b1
    y = _gelu_exact(y)
    y = layernorm(y, g1, be1)

    # ---- block 2: Linear -> GELU -> LayerNorm ----
    y = jnp.dot(y.astype(jnp.bfloat16), w2_ref[...],
                preferred_element_type=jnp.float32) + b2
    y = _gelu_exact(y)
    y = layernorm(y, g2, be2)

    # ---- residual (re-read x so it is not live across the whole kernel) ----
    out_ref[...] = (x_ref[...].astype(jnp.float32) + y).astype(out_ref.dtype)


def prepare_params(params, D):
    """One-time weight prep: bf16 cast + lane padding + param-vector packing."""
    Dp = _round_up(max(D, 128), 128)

    def pad_w(w):  # (D, D) (in, out) f32 -> (Dp, Dp) bf16, zero-padded
        w = w.astype(jnp.bfloat16)
        if Dp != D:
            w = jnp.pad(w, ((0, Dp - D), (0, Dp - D)))
        return w

    def pad_v(v):  # (D,) -> (Dp,) f32, zero-padded
        v = v.astype(jnp.float32)
        if Dp != D:
            v = jnp.pad(v, (0, Dp - D))
        return v

    rows = [params["b1"], params["g1"], params["beta1"],
            params["b2"], params["g2"], params["beta2"]]
    vec_pack = jnp.zeros((8, Dp), jnp.float32).at[:6].set(
        jnp.stack([pad_v(r) for r in rows]))

    return {"w1": pad_w(params["w1"]), "w2": pad_w(params["w2"]),
            "vecs": vec_pack, "d": D, "dp": Dp}


def res_norm_layer(x, prepared, *, row_tile=512):
    """x: [..., D]. prepared: output of prepare_params (weights stored (in, out))."""
    orig_shape = x.shape
    D, Dp = prepared["d"], prepared["dp"]
    assert orig_shape[-1] == D
    x2d = x.reshape(-1, D)
    M = x2d.shape[0]

    # Lane padding only when needed. Rows are never padded: Pallas clips the
    # ragged last row block and rows are independent, so no (Mp, Dp) copy.
    x_in = x2d if Dp == D else jnp.pad(x2d, ((0, 0), (0, Dp - D)))

    # Row tile: multiple of 8, >= 2 grid steps so both v7x TCs get work.
    TM = min(row_tile, max(8, _round_up(pl.cdiv(M, 2), 8)))

    itemsize = jnp.dtype(x.dtype).itemsize

    def vmem_need(tm):
        return (2 * Dp * Dp * 2              # two bf16 weights, single-buffered
                + 8 * Dp * 4                 # packed param vectors, single-buffered
                + 2 * 2 * tm * Dp * itemsize # double-buffered x / out tiles
                + 6 * tm * Dp * 4)           # f32 intermediate headroom

    try:
        cap = int(pltpu.get_tpu_info().vmem_capacity_bytes) - (8 << 20)
    except Exception:
        cap = 56 << 20  # conservative: v7x has 64 MiB VMEM per TensorCore

    while TM > 64 and vmem_need(TM) > cap:
        TM = _round_up(TM // 2, 8)

    grid = (pl.cdiv(M, TM),)
    vmem_limit = int(min(max(int(1.25 * vmem_need(TM)), 32 << 20), cap))

    cost = pl.CostEstimate(
        flops=4 * M * Dp * Dp,          # two (TM x Dp) @ (Dp x Dp) matmuls per row
        transcendentals=2 * M * Dp,     # two erf evaluations per element
        bytes_accessed=2 * M * Dp * itemsize + 2 * Dp * Dp * 2 + 8 * Dp * 4,
    )

    def build(single_buffer_consts):
        const_kw = {"pipeline_mode": pl.Buffered(1)} if single_buffer_consts else {}
        row_spec = pl.BlockSpec((TM, Dp), lambda i: (i, 0))
        w_spec = pl.BlockSpec((Dp, Dp), lambda i: (0, 0), **const_kw)
        vec_spec = pl.BlockSpec((8, Dp), lambda i: (0, 0), **const_kw)
        return pl.pallas_call(
            functools.partial(res_norm_kernel, d_valid=D),
            out_shape=jax.ShapeDtypeStruct((M, Dp), x.dtype),
            grid=grid,
            in_specs=[row_spec, w_spec, w_spec, vec_spec],
            out_specs=row_spec,
            compiler_params=pltpu.CompilerParams(
                dimension_semantics=("parallel",),
                vmem_limit_bytes=vmem_limit,
            ),
            cost_estimate=cost,
        )

    args = (x_in, prepared["w1"], prepared["w2"], prepared["vecs"])
    try:
        out = build(True)(*args)
    except Exception:
        # Fallback for JAX versions that reject Buffered(1) on the top-level
        # grid pipeline; double-buffering the constant blocks is still correct.
        out = build(False)(*args)

    if Dp != D:
        out = out[:, :D]
    return out.reshape(orig_shape)


def init_params(key, D):
    # Deterministic synthetic init mirroring nn.Linear / nn.LayerNorm shapes.
    k1, k2, k3, k4 = jax.random.split(key, 4)
    bound = 1.0 / math.sqrt(D)
    # PyTorch Linear weight is (out, in); build (out, in) then transpose to (in, out).
    w1_oi = jax.random.uniform(k1, (D, D), jnp.float32, -bound, bound)
    b1 = jax.random.uniform(k2, (D,), jnp.float32, -bound, bound)
    w2_oi = jax.random.uniform(k3, (D, D), jnp.float32, -bound, bound)
    b2 = jax.random.uniform(k4, (D,), jnp.float32, -bound, bound)
    return {
        "w1": w1_oi.T, "b1": b1,
        "g1": jnp.ones((D,), jnp.float32), "beta1": jnp.zeros((D,), jnp.float32),
        "w2": w2_oi.T, "b2": b2,
        "g2": jnp.ones((D,), jnp.float32), "beta2": jnp.zeros((D,), jnp.float32),
    }


def res_norm_ref(x, params):
    # Pure-JAX f32 reference using the same bf16-rounded weight values the
    # kernel consumes (activations stay f32 here, bf16 in the kernel matmuls).
    def ln(v, g, b):
        m = jnp.mean(v, -1, keepdims=True)
        c = v - m
        var = jnp.mean(c * c, -1, keepdims=True)
        return c * jax.lax.rsqrt(var + LN_EPS) * g + b

    w1 = params["w1"].astype(jnp.bfloat16).astype(jnp.float32)
    w2 = params["w2"].astype(jnp.bfloat16).astype(jnp.float32)
    y = x @ w1 + params["b1"]
    y = _gelu_exact(y)
    y = ln(y, params["g1"], params["beta1"])
    y = y @ w2 + params["b2"]
    y = _gelu_exact(y)
    y = ln(y, params["g2"], params["beta2"])
    return x + y


if __name__ == "__main__":
    B, S, D = 2, 8, 32  # batch=2, seq=8, hidden=32
    key = jax.random.PRNGKey(0)
    kx, kp = jax.random.split(key)
    x = jax.random.normal(kx, (B, S, D), jnp.float32)
    params = init_params(kp, D)

    prepared = prepare_params(params, D)     # one-time weight prep (hoisted)
    out = res_norm_layer(x, prepared)
    jax.block_until_ready(out)

    ref = res_norm_ref(x, params)
    assert out.shape == x.shape
    # bf16 matmul operands (f32 accumulation) vs full-f32-activation reference.
    assert jnp.allclose(out, ref, atol=3e-2, rtol=3e-2), "mismatch vs reference"
    print("KERNEL_OK")
</pallas_src>

<mosaic_0001>
module attributes {stable_mosaic.version = 11 : i64} {
  func.func @res_norm_kernel(%arg0: i32, %arg1: memref<8x128xf32, #tpu.memory_space<vmem>>, %arg2: memref<128x128xbf16, #tpu.memory_space<vmem>>, %arg3: memref<128x128xbf16, #tpu.memory_space<vmem>>, %arg4: memref<8x128xf32, #tpu.memory_space<vmem>>, %arg5: memref<8x128xf32, #tpu.memory_space<vmem>>) attributes {dimension_semantics = [#tpu.dimension_semantics<parallel>], iteration_bounds = array<i64: 2>, scalar_prefetch = 0 : i64, scratch_operands = 0 : i64, tpu.core_type = #tpu.core_type<tc>, window_params = [{transform_indices = @transform_0, window_bounds = array<i64: 8, 128>}, {pipeline_mode = #tpu.pipeline_mode<synchronous>, transform_indices = @transform_1, window_bounds = array<i64: 128, 128>}, {pipeline_mode = #tpu.pipeline_mode<synchronous>, transform_indices = @transform_2, window_bounds = array<i64: 128, 128>}, {pipeline_mode = #tpu.pipeline_mode<synchronous>, transform_indices = @transform_3, window_bounds = array<i64: 8, 128>}, {transform_indices = @transform_4, window_bounds = array<i64: 8, 128>}]} {
    %c0 = arith.constant 0 : index
    %c0_0 = arith.constant 0 : index
    %0 = vector.load %arg4[%c0, %c0_0] : memref<8x128xf32, #tpu.memory_space<vmem>>, vector<8x128xf32>
    %1 = vector.extract_strided_slice %0 {offsets = [0, 0], sizes = [1, 128], strides = [1, 1]} : vector<8x128xf32> to vector<1x128xf32>
    %2 = vector.extract_strided_slice %0 {offsets = [1, 0], sizes = [1, 128], strides = [1, 1]} : vector<8x128xf32> to vector<1x128xf32>
    %3 = vector.extract_strided_slice %0 {offsets = [2, 0], sizes = [1, 128], strides = [1, 1]} : vector<8x128xf32> to vector<1x128xf32>
    %4 = vector.extract_strided_slice %0 {offsets = [3, 0], sizes = [1, 128], strides = [1, 1]} : vector<8x128xf32> to vector<1x128xf32>
    %5 = vector.extract_strided_slice %0 {offsets = [4, 0], sizes = [1, 128], strides = [1, 1]} : vector<8x128xf32> to vector<1x128xf32>
    %6 = vector.extract_strided_slice %0 {offsets = [5, 0], sizes = [1, 128], strides = [1, 1]} : vector<8x128xf32> to vector<1x128xf32>
    %7 = tpu.iota {dimensions = array<i32: 1>} : vector<1x128xi32>
    %c32_i32 = arith.constant 32 : i32
    %8 = vector.broadcast %c32_i32 : i32 to vector<1x128xi32>
    %9 = arith.cmpi slt, %7, %8 : vector<1x128xi32>
    %10 = arith.extui %9 : vector<1x128xi1> to vector<1x128xi32>
    %11 = arith.sitofp %10 : vector<1x128xi32> to vector<1x128xf32>
    %c0_1 = arith.constant 0 : index
    %c0_2 = arith.constant 0 : index
    %12 = vector.load %arg1[%c0_1, %c0_2] : memref<8x128xf32, #tpu.memory_space<vmem>>, vector<8x128xf32>
    %13 = arith.truncf %12 : vector<8x128xf32> to vector<8x128xbf16>
    %c0_3 = arith.constant 0 : index
    %c0_4 = arith.constant 0 : index
    %14 = vector.load %arg2[%c0_3, %c0_4] : memref<128x128xbf16, #tpu.memory_space<vmem>>, vector<128x128xbf16>
    %cst = arith.constant dense<0.000000e+00> : vector<8x128xf32>
    %15 = tpu.matmul %13, %14, %cst {dimension_numbers = #tpu.dot_dimension_numbers<[1], [0], [0], [1], [0, 0, 1, 1], [], []>} : vector<8x128xbf16>, vector<128x128xbf16>, vector<8x128xf32> -> vector<8x128xf32>
    %16 = vector.broadcast %1 : vector<1x128xf32> to vector<8x128xf32>
    %17 = arith.addf %15, %16 : vector<8x128xf32>
    %cst_5 = arith.constant 5.000000e-01 : f32
    %18 = vector.broadcast %cst_5 : f32 to vector<8x128xf32>
    %19 = arith.mulf %18, %17 : vector<8x128xf32>
    %cst_6 = arith.constant 0.707106769 : f32
    %20 = vector.broadcast %cst_6 : f32 to vector<8x128xf32>
    %21 = arith.mulf %17, %20 : vector<8x128xf32>
    %22 = math.erf %21 : vector<8x128xf32>
    %cst_7 = arith.constant 1.000000e+00 : f32
    %23 = vector.broadcast %cst_7 : f32 to vector<8x128xf32>
    %24 = arith.addf %23, %22 : vector<8x128xf32>
    %25 = arith.mulf %19, %24 : vector<8x128xf32>
    %26 = vector.broadcast %11 : vector<1x128xf32> to vector<8x128xf32>
    %27 = arith.mulf %25, %26 : vector<8x128xf32>
    %cst_8 = arith.constant dense<0.000000e+00> : vector<8xf32>
    %28 = vector.multi_reduction <add>, %27, %cst_8 [1] : vector<8x128xf32> to vector<8xf32>
    %29 = vector.shape_cast %28 : vector<8xf32> to vector<8x1xf32>
    %cst_9 = arith.constant 3.125000e-02 : f32
    %30 = vector.broadcast %cst_9 : f32 to vector<8x1xf32>
    %31 = arith.mulf %29, %30 : vector<8x1xf32>
    %32 = vector.broadcast %31 : vector<8x1xf32> to vector<8x128xf32>
    %33 = arith.subf %25, %32 : vector<8x128xf32>
    %34 = arith.mulf %33, %33 : vector<8x128xf32>
    %35 = vector.broadcast %11 : vector<1x128xf32> to vector<8x128xf32>
    %36 = arith.mulf %34, %35 : vector<8x128xf32>
    %cst_10 = arith.constant dense<0.000000e+00> : vector<8xf32>
    %37 = vector.multi_reduction <add>, %36, %cst_10 [1] : vector<8x128xf32> to vector<8xf32>
    %38 = vector.shape_cast %37 : vector<8xf32> to vector<8x1xf32>
    %cst_11 = arith.constant 3.125000e-02 : f32
    %39 = vector.broadcast %cst_11 : f32 to vector<8x1xf32>
    %40 = arith.mulf %38, %39 : vector<8x1xf32>
    %cst_12 = arith.constant 9.99999974E-6 : f32
    %41 = vector.broadcast %cst_12 : f32 to vector<8x1xf32>
    %42 = arith.addf %40, %41 : vector<8x1xf32>
    %43 = math.rsqrt %42 : vector<8x1xf32>
    %44 = vector.broadcast %43 : vector<8x1xf32> to vector<8x128xf32>
    %45 = arith.mulf %33, %44 : vector<8x128xf32>
    %46 = vector.broadcast %2 : vector<1x128xf32> to vector<8x128xf32>
    %47 = arith.mulf %45, %46 : vector<8x128xf32>
    %48 = vector.broadcast %3 : vector<1x128xf32> to vector<8x128xf32>
    %49 = arith.addf %47, %48 : vector<8x128xf32>
    %50 = arith.truncf %49 : vector<8x128xf32> to vector<8x128xbf16>
    %c0_13 = arith.constant 0 : index
    %c0_14 = arith.constant 0 : index
    %51 = vector.load %arg3[%c0_13, %c0_14] : memref<128x128xbf16, #tpu.memory_space<vmem>>, vector<128x128xbf16>
    %cst_15 = arith.constant dense<0.000000e+00> : vector<8x128xf32>
    %52 = tpu.matmul %50, %51, %cst_15 {dimension_numbers = #tpu.dot_dimension_numbers<[1], [0], [0], [1], [0, 0, 1, 1], [], []>} : vector<8x128xbf16>, vector<128x128xbf16>, vector<8x128xf32> -> vector<8x128xf32>
    %53 = vector.broadcast %4 : vector<1x128xf32> to vector<8x128xf32>
    %54 = arith.addf %52, %53 : vector<8x128xf32>
    %cst_16 = arith.constant 5.000000e-01 : f32
    %55 = vector.broadcast %cst_16 : f32 to vector<8x128xf32>
    %56 = arith.mulf %55, %54 : vector<8x128xf32>
    %cst_17 = arith.constant 0.707106769 : f32
    %57 = vector.broadcast %cst_17 : f32 to vector<8x128xf32>
    %58 = arith.mulf %54, %57 : vector<8x128xf32>
    %59 = math.erf %58 : vector<8x128xf32>
    %cst_18 = arith.constant 1.000000e+00 : f32
    %60 = vector.broadcast %cst_18 : f32 to vector<8x128xf32>
    %61 = arith.addf %60, %59 : vector<8x128xf32>
    %62 = arith.mulf %56, %61 : vector<8x128xf32>
    %63 = vector.broadcast %11 : vector<1x128xf32> to vector<8x128xf32>
    %64 = arith.mulf %62, %63 : vector<8x128xf32>
    %cst_19 = arith.constant dense<0.000000e+00> : vector<8xf32>
    %65 = vector.multi_reduction <add>, %64, %cst_19 [1] : vector<8x128xf32> to vector<8xf32>
    %66 = vector.shape_cast %65 : vector<8xf32> to vector<8x1xf32>
    %cst_20 = arith.constant 3.125000e-02 : f32
    %67 = vector.broadcast %cst_20 : f32 to vector<8x1xf32>
    %68 = arith.mulf %66, %67 : vector<8x1xf32>
    %69 = vector.broadcast %68 : vector<8x1xf32> to vector<8x128xf32>
    %70 = arith.subf %62, %69 : vector<8x128xf32>
    %71 = arith.mulf %70, %70 : vector<8x128xf32>
    %72 = vector.broadcast %11 : vector<1x128xf32> to vector<8x128xf32>
    %73 = arith.mulf %71, %72 : vector<8x128xf32>
    %cst_21 = arith.constant dense<0.000000e+00> : vector<8xf32>
    %74 = vector.multi_reduction <add>, %73, %cst_21 [1] : vector<8x128xf32> to vector<8xf32>
    %75 = vector.shape_cast %74 : vector<8xf32> to vector<8x1xf32>
    %cst_22 = arith.constant 3.125000e-02 : f32
    %76 = vector.broadcast %cst_22 : f32 to vector<8x1xf32>
    %77 = arith.mulf %75, %76 : vector<8x1xf32>
    %cst_23 = arith.constant 9.99999974E-6 : f32
    %78 = vector.broadcast %cst_23 : f32 to vector<8x1xf32>
    %79 = arith.addf %77, %78 : vector<8x1xf32>
    %80 = math.rsqrt %79 : vector<8x1xf32>
    %81 = vector.broadcast %80 : vector<8x1xf32> to vector<8x128xf32>
    %82 = arith.mulf %70, %81 : vector<8x128xf32>
    %83 = vector.broadcast %5 : vector<1x128xf32> to vector<8x128xf32>
    %84 = arith.mulf %82, %83 : vector<8x128xf32>
    %85 = vector.broadcast %6 : vector<1x128xf32> to vector<8x128xf32>
    %86 = arith.addf %84, %85 : vector<8x128xf32>
    %c0_24 = arith.constant 0 : index
    %c0_25 = arith.constant 0 : index
    %87 = vector.load %arg1[%c0_24, %c0_25] : memref<8x128xf32, #tpu.memory_space<vmem>>, vector<8x128xf32>
    %88 = arith.addf %87, %86 : vector<8x128xf32>
    %c0_26 = arith.constant 0 : index
    %c0_27 = arith.constant 0 : index
    %89 = vector.load %arg5[%c0_26, %c0_27] : memref<8x128xf32, #tpu.memory_space<vmem>>, vector<8x128xf32>
    tpu.vector_store %arg5[%c0_26, %c0_27], %88 {strides = array<i32>} : memref<8x128xf32, #tpu.memory_space<vmem>>, vector<8x128xf32>,
    return
  }
  func.func @transform_0(%arg0: i32) -> (i32, i32) {
    %c0_i32 = arith.constant 0 : i32
    %c0_i32_0 = arith.constant 0 : i32
    return %arg0, %c0_i32 : i32, i32
  }
  func.func @transform_1(%arg0: i32) -> (i32, i32) {
    %c0_i32 = arith.constant 0 : i32
    %c0_i32_0 = arith.constant 0 : i32
    %c0_i32_1 = arith.constant 0 : i32
    return %c0_i32, %c0_i32_0 : i32, i32
  }
  func.func @transform_2(%arg0: i32) -> (i32, i32) {
    %c0_i32 = arith.constant 0 : i32
    %c0_i32_0 = arith.constant 0 : i32
    %c0_i32_1 = arith.constant 0 : i32
    return %c0_i32, %c0_i32_0 : i32, i32
  }
  func.func @transform_3(%arg0: i32) -> (i32, i32) {
    %c0_i32 = arith.constant 0 : i32
    %c0_i32_0 = arith.constant 0 : i32
    %c0_i32_1 = arith.constant 0 : i32
    return %c0_i32, %c0_i32_0 : i32, i32
  }
  func.func @transform_4(%arg0: i32) -> (i32, i32) {
    %c0_i32 = arith.constant 0 : i32
    %c0_i32_0 = arith.constant 0 : i32
    return %arg0, %c0_i32 : i32, i32
  }
}

module attributes {stable_mosaic.version = 11 : i64} {
  func.func @res_norm_kernel(%arg0: i32, %arg1: memref<8x128xf32, #tpu.memory_space<vmem>>, %arg2: memref<128x128xbf16, #tpu.memory_space<vmem>>, %arg3: memref<128x128xbf16, #tpu.memory_space<vmem>>, %arg4: memref<8x128xf32, #tpu.memory_space<vmem>>, %arg5: memref<8x128xf32, #tpu.memory_space<vmem>>) attributes {dimension_semantics = [#tpu.dimension_semantics<parallel>], iteration_bounds = array<i64: 2>, scalar_prefetch = 0 : i64, scratch_operands = 0 : i64, tpu.core_type = #tpu.core_type<tc>, window_params = [{transform_indices = @transform_0, window_bounds = array<i64: 8, 128>}, {pipeline_mode = #tpu.pipeline_mode<synchronous>, transform_indices = @transform_1, window_bounds = array<i64: 128, 128>}, {pipeline_mode = #tpu.pipeline_mode<synchronous>, transform_indices = @transform_2, window_bounds = array<i64: 128, 128>}, {pipeline_mode = #tpu.pipeline_mode<synchronous>, transform_indices = @transform_3, window_bounds = array<i64: 8, 128>}, {transform_indices = @transform_4, window_bounds = array<i64: 8, 128>}]} {
    %c0 = arith.constant 0 : index
    %c0_0 = arith.constant 0 : index
    %0 = vector.load %arg4[%c0, %c0_0] : memref<8x128xf32, #tpu.memory_space<vmem>>, vector<8x128xf32>
    %1 = vector.extract_strided_slice %0 {offsets = [0, 0], sizes = [1, 128], strides = [1, 1]} : vector<8x128xf32> to vector<1x128xf32>
    %2 = vector.extract_strided_slice %0 {offsets = [1, 0], sizes = [1, 128], strides = [1, 1]} : vector<8x128xf32> to vector<1x128xf32>
    %3 = vector.extract_strided_slice %0 {offsets = [2, 0], sizes = [1, 128], strides = [1, 1]} : vector<8x128xf32> to vector<1x128xf32>
    %4 = vector.extract_strided_slice %0 {offsets = [3, 0], sizes = [1, 128], strides = [1, 1]} : vector<8x128xf32> to vector<1x128xf32>
    %5 = vector.extract_strided_slice %0 {offsets = [4, 0], sizes = [1, 128], strides = [1, 1]} : vector<8x128xf32> to vector<1x128xf32>
    %6 = vector.extract_strided_slice %0 {offsets = [5, 0], sizes = [1, 128], strides = [1, 1]} : vector<8x128xf32> to vector<1x128xf32>
    %7 = tpu.iota {dimensions = array<i32: 1>} : vector<1x128xi32>
    %c32_i32 = arith.constant 32 : i32
    %8 = vector.broadcast %c32_i32 : i32 to vector<1x128xi32>
    %9 = arith.cmpi slt, %7, %8 : vector<1x128xi32>
    %10 = arith.extui %9 : vector<1x128xi1> to vector<1x128xi32>
    %11 = arith.sitofp %10 : vector<1x128xi32> to vector<1x128xf32>
    %c0_1 = arith.constant 0 : index
    %c0_2 = arith.constant 0 : index
    %12 = vector.load %arg1[%c0_1, %c0_2] : memref<8x128xf32, #tpu.memory_space<vmem>>, vector<8x128xf32>
    %13 = arith.truncf %12 : vector<8x128xf32> to vector<8x128xbf16>
    %c0_3 = arith.constant 0 : index
    %c0_4 = arith.constant 0 : index
    %14 = vector.load %arg2[%c0_3, %c0_4] : memref<128x128xbf16, #tpu.memory_space<vmem>>, vector<128x128xbf16>
    %cst = arith.constant dense<0.000000e+00> : vector<8x128xf32>
    %15 = tpu.matmul %13, %14, %cst {dimension_numbers = #tpu.dot_dimension_numbers<[1], [0], [0], [1], [0, 0, 1, 1], [], []>} : vector<8x128xbf16>, vector<128x128xbf16>, vector<8x128xf32> -> vector<8x128xf32>
    %16 = vector.broadcast %1 : vector<1x128xf32> to vector<8x128xf32>
    %17 = arith.addf %15, %16 : vector<8x128xf32>
    %cst_5 = arith.constant 5.000000e-01 : f32
    %18 = vector.broadcast %cst_5 : f32 to vector<8x128xf32>
    %19 = arith.mulf %18, %17 : vector<8x128xf32>
    %cst_6 = arith.constant 0.707106769 : f32
    %20 = vector.broadcast %cst_6 : f32 to vector<8x128xf32>
    %21 = arith.mulf %17, %20 : vector<8x128xf32>
    %22 = math.erf %21 : vector<8x128xf32>
    %cst_7 = arith.constant 1.000000e+00 : f32
    %23 = vector.broadcast %cst_7 : f32 to vector<8x128xf32>
    %24 = arith.addf %23, %22 : vector<8x128xf32>
    %25 = arith.mulf %19, %24 : vector<8x128xf32>
    %26 = vector.broadcast %11 : vector<1x128xf32> to vector<8x128xf32>
    %27 = arith.mulf %25, %26 : vector<8x128xf32>
    %cst_8 = arith.constant dense<0.000000e+00> : vector<8xf32>
    %28 = vector.multi_reduction <add>, %27, %cst_8 [1] : vector<8x128xf32> to vector<8xf32>
    %29 = vector.shape_cast %28 : vector<8xf32> to vector<8x1xf32>
    %cst_9 = arith.constant 3.125000e-02 : f32
    %30 = vector.broadcast %cst_9 : f32 to vector<8x1xf32>
    %31 = arith.mulf %29, %30 : vector<8x1xf32>
    %32 = vector.broadcast %31 : vector<8x1xf32> to vector<8x128xf32>
    %33 = arith.subf %25, %32 : vector<8x128xf32>
    %34 = arith.mulf %33, %33 : vector<8x128xf32>
    %35 = vector.broadcast %11 : vector<1x128xf32> to vector<8x128xf32>
    %36 = arith.mulf %34, %35 : vector<8x128xf32>
    %cst_10 = arith.constant dense<0.000000e+00> : vector<8xf32>
    %37 = vector.multi_reduction <add>, %36, %cst_10 [1] : vector<8x128xf32> to vector<8xf32>
    %38 = vector.shape_cast %37 : vector<8xf32> to vector<8x1xf32>
    %cst_11 = arith.constant 3.125000e-02 : f32
    %39 = vector.broadcast %cst_11 : f32 to vector<8x1xf32>
    %40 = arith.mulf %38, %39 : vector<8x1xf32>
    %cst_12 = arith.constant 9.99999974E-6 : f32
    %41 = vector.broadcast %cst_12 : f32 to vector<8x1xf32>
    %42 = arith.addf %40, %41 : vector<8x1xf32>
    %43 = math.rsqrt %42 : vector<8x1xf32>
    %44 = vector.broadcast %43 : vector<8x1xf32> to vector<8x128xf32>
    %45 = arith.mulf %33, %44 : vector<8x128xf32>
    %46 = vector.broadcast %2 : vector<1x128xf32> to vector<8x128xf32>
    %47 = arith.mulf %45, %46 : vector<8x128xf32>
    %48 = vector.broadcast %3 : vector<1x128xf32> to vector<8x128xf32>
    %49 = arith.addf %47, %48 : vector<8x128xf32>
    %50 = arith.truncf %49 : vector<8x128xf32> to vector<8x128xbf16>
    %c0_13 = arith.constant 0 : index
    %c0_14 = arith.constant 0 : index
    %51 = vector.load %arg3[%c0_13, %c0_14] : memref<128x128xbf16, #tpu.memory_space<vmem>>, vector<128x128xbf16>
    %cst_15 = arith.constant dense<0.000000e+00> : vector<8x128xf32>
    %52 = tpu.matmul %50, %51, %cst_15 {dimension_numbers = #tpu.dot_dimension_numbers<[1], [0], [0], [1], [0, 0, 1, 1], [], []>} : vector<8x128xbf16>, vector<128x128xbf16>, vector<8x128xf32> -> vector<8x128xf32>
    %53 = vector.broadcast %4 : vector<1x128xf32> to vector<8x128xf32>
    %54 = arith.addf %52, %53 : vector<8x128xf32>
    %cst_16 = arith.constant 5.000000e-01 : f32
    %55 = vector.broadcast %cst_16 : f32 to vector<8x128xf32>
    %56 = arith.mulf %55, %54 : vector<8x128xf32>
    %cst_17 = arith.constant 0.707106769 : f32
    %57 = vector.broadcast %cst_17 : f32 to vector<8x128xf32>
    %58 = arith.mulf %54, %57 : vector<8x128xf32>
    %59 = math.erf %58 : vector<8x128xf32>
    %cst_18 = arith.constant 1.000000e+00 : f32
    %60 = vector.broadcast %cst_18 : f32 to vector<8x128xf32>
    %61 = arith.addf %60, %59 : vector<8x128xf32>
    %62 = arith.mulf %56, %61 : vector<8x128xf32>
    %63 = vector.broadcast %11 : vector<1x128xf32> to vector<8x128xf32>
    %64 = arith.mulf %62, %63 : vector<8x128xf32>
    %cst_19 = arith.constant dense<0.000000e+00> : vector<8xf32>
    %65 = vector.multi_reduction <add>, %64, %cst_19 [1] : vector<8x128xf32> to vector<8xf32>
    %66 = vector.shape_cast %65 : vector<8xf32> to vector<8x1xf32>
    %cst_20 = arith.constant 3.125000e-02 : f32
    %67 = vector.broadcast %cst_20 : f32 to vector<8x1xf32>
    %68 = arith.mulf %66, %67 : vector<8x1xf32>
    %69 = vector.broadcast %68 : vector<8x1xf32> to vector<8x128xf32>
    %70 = arith.subf %62, %69 : vector<8x128xf32>
    %71 = arith.mulf %70, %70 : vector<8x128xf32>
    %72 = vector.broadcast %11 : vector<1x128xf32> to vector<8x128xf32>
    %73 = arith.mulf %71, %72 : vector<8x128xf32>
    %cst_21 = arith.constant dense<0.000000e+00> : vector<8xf32>
    %74 = vector.multi_reduction <add>, %73, %cst_21 [1] : vector<8x128xf32> to vector<8xf32>
    %75 = vector.shape_cast %74 : vector<8xf32> to vector<8x1xf32>
    %cst_22 = arith.constant 3.125000e-02 : f32
    %76 = vector.broadcast %cst_22 : f32 to vector<8x1xf32>
    %77 = arith.mulf %75, %76 : vector<8x1xf32>
    %cst_23 = arith.constant 9.99999974E-6 : f32
    %78 = vector.broadcast %cst_23 : f32 to vector<8x1xf32>
    %79 = arith.addf %77, %78 : vector<8x1xf32>
    %80 = math.rsqrt %79 : vector<8x1xf32>
    %81 = vector.broadcast %80 : vector<8x1xf32> to vector<8x128xf32>
    %82 = arith.mulf %70, %81 : vector<8x128xf32>
    %83 = vector.broadcast %5 : vector<1x128xf32> to vector<8x128xf32>
    %84 = arith.mulf %82, %83 : vector<8x128xf32>
    %85 = vector.broadcast %6 : vector<1x128xf32> to vector<8x128xf32>
    %86 = arith.addf %84, %85 : vector<8x128xf32>
    %c0_24 = arith.constant 0 : index
    %c0_25 = arith.constant 0 : index
    %87 = vector.load %arg1[%c0_24, %c0_25] : memref<8x128xf32, #tpu.memory_space<vmem>>, vector<8x128xf32>
    %88 = arith.addf %87, %86 : vector<8x128xf32>
    %c0_26 = arith.constant 0 : index
    %c0_27 = arith.constant 0 : index
    %89 = vector.load %arg5[%c0_26, %c0_27] : memref<8x128xf32, #tpu.memory_space<vmem>>, vector<8x128xf32>
    tpu.vector_store %arg5[%c0_26, %c0_27], %88 {strides = array<i32>} : memref<8x128xf32, #tpu.memory_space<vmem>>, vector<8x128xf32>,
    return
  }
  func.func @transform_0(%arg0: i32) -> (i32, i32) {
    %c0_i32 = arith.constant 0 : i32
    %c0_i32_0 = arith.constant 0 : i32
    return %arg0, %c0_i32 : i32, i32
  }
  func.func @transform_1(%arg0: i32) -> (i32, i32) {
    %c0_i32 = arith.constant 0 : i32
    %c0_i32_0 = arith.constant 0 : i32
    %c0_i32_1 = arith.constant 0 : i32
    return %c0_i32, %c0_i32_0 : i32, i32
  }
  func.func @transform_2(%arg0: i32) -> (i32, i32) {
    %c0_i32 = arith.constant 0 : i32
    %c0_i32_0 = arith.constant 0 : i32
    %c0_i32_1 = arith.constant 0 : i32
    return %c0_i32, %c0_i32_0 : i32, i32
  }
  func.func @transform_3(%arg0: i32) -> (i32, i32) {
    %c0_i32 = arith.constant 0 : i32
    %c0_i32_0 = arith.constant 0 : i32
    %c0_i32_1 = arith.constant 0 : i32
    return %c0_i32, %c0_i32_0 : i32, i32
  }
  func.func @transform_4(%arg0: i32) -> (i32, i32) {
    %c0_i32 = arith.constant 0 : i32
    %c0_i32_0 = arith.constant 0 : i32
    return %arg0, %c0_i32 : i32, i32
  }
}

</mosaic_0001>

<bundles_post_ra>
// kernel: tpu_custom_call.1
= control target key start
LH: loop header
LB: loop body
LE: loop exit
PB: predicated region body
PF: predicated region fallthrough
CT: control target
= control target key end

     0   :  { %9 = vsyncpa [#allocation3], 0  ;;  %s1280_s0 = inlined_call_operand.hbm [shape: f32[16,128], index: 0, kind: input, shape index: {}]   ;;  %s1281_s1 = inlined_call_operand.hbm [shape: bf16[128,128], index: 1, kind: input, shape index: {}]   ;;  %s1282_s2 = inlined_call_operand.hbm [shape: bf16[128,128], index: 2, kind: input, shape index: {}]   ;;  %s1283_s3 = inlined_call_operand.hbm [shape: f32[8,128], index: 3, kind: input, shape index: {}]   ;;  %s1284_s4 = inlined_call_operand.hbm [shape: f32[16,128], index: 4, kind: output, shape index: {}]  }
   0x1   :  { %11 = vsyncpa [#allocation3 + $0x1], 0 }
   0x2   :  { %12 = vsyncpa [#allocation6], 0 }
   0x3   :  { %13 = vsyncpa [#allocation9], 0 }
   0x4   :  { %14 = vsyncpa [#allocation4], 0 }
   0x5   :  { %16 = vsyncpa [#allocation4 + $0x1], 0  ;;  %s1101_s15 = smov 0   ;;  %s1103_s16 = smov 0  }
   0x6   :  { %s1105_s17 = smov 0   ;;  %s1107_s18 = smov 0  }
   0x7 LB: > { %s153_s21 = sshll.u32 %s1281_s1, 4  ;;  %s1125_s22 = sadd.s32 4294967295, %s1068_s18   ;;  %s1068_s18 = sphi %s1107_s18, %s1295_s18   ;;  %s1064_s17 = sphi %s1105_s17, %s1294_s17   ;;  %s1060_s16 = sphi %s1103_s16, %s1293_s16   ;;  %s1056_s15 = sphi %s1101_s15, %s1292_s15   ;;  %s154_s21 = int_to_ptr.hbm [resolvable:$true] %s153_s21 }
   0x8   : > { %p686_p0 = scmp.ge.s32.totalorder %s1068_s18, 1  ;;  %p43_p1 = scmp.eq.s32.totalorder %s1125_s22, 0 }
   0x9   : > { %p142_p2 = scmp.lt.s32.totalorder %s1068_s18, 3  ;;  %s1070_s24 = smov [#allocation5]  }
   0xa   : > { %s155_s25 = sshll.u32 %s1070_s24, 4  ;;  %s167_s28 = sshll.u32 %s1282_s2, 4  ;;  %s156_s25 = int_to_ptr.vmem [resolvable:$true] %s155_s25  ;;  %s168_s28 = int_to_ptr.hbm [resolvable:$true] %s167_s28 }
   0xb   : > { %p1130_p3 = pnand %p686_p0, %p142_p2  ;;  %s182_s6 = sshll.u32 %s1283_s3, 4  ;;  %s183_s6 = int_to_ptr.hbm [resolvable:$true] %s182_s6 }
   0xc   : > { %s1071_s7 = smov [#allocation7]   ;;  %s1072_s9 = smov 64  }
   0xd   : > { %p802_p4 = pneg %p1130_p3  ;;  %s169_s8 = sshll.u32 %s1071_s7, 4  ;;  %s170_s8 = int_to_ptr.vmem [resolvable:$true] %s169_s8 }
   0xe   : > { %s1073_s10 = smov 4   ;;  %s1074_s11 = smov [#allocation8]  }
   0xf   : > { %p1142_p6 = pnand %p802_p4, %p43_p1  ;;  %s184_s12 = sshll.u32 %s1074_s11, 4  ;;  %s185_s12 = int_to_ptr.vmem [resolvable:$true] %s184_s12 }
  0x10   : > { %s685_s13 = sadd.s32 4294967294, %s1068_s18   ;;  %s1157_s14 = sadd.s32 1, %s1068_s18  }
  0x11   : > { %805 = dma.hbm_to_vmem [thread:$0]  (!%p1142_p6), %s154_s21, 1024, %s156_s25, [#allocation6], %s1072_s9, %s1072_s9, %s1073_s10  }
  0x12   : > { %808 = dma.hbm_to_vmem [thread:$0]  (!%p1142_p6), %s168_s28, 1024, %s170_s8, [#allocation6], %s1072_s9, %s1072_s9, %s1073_s10  }
  0x13   : > { %811 = dma.hbm_to_vmem [thread:$0]  (!%p1142_p6), %s183_s6, 128, %s185_s12, [#allocation9]  }
  0x14   : > { %s29_s19 = sadd.s32 1, %s1064_s17  ;;  %s26_s20 = ssub.s32 %s1068_s18, %s1157_s14 }
  0x15   : > { %p36_p7 = scmp.ne.s32.totalorder %s1064_s17, %s1060_s16  ;;  %p27_p8 = scmp.eq.s32.totalorder %s26_s20, 0 }
  0x16   : > { %p37_p9 = scmp.eq.s32.totalorder %s1068_s18, 0  ;;  %p42_p10 = scmp.ne.s32.totalorder %s1060_s16, %s1056_s15 }
  0x17   : > { %p129_p11 = scmp.eq.s32.totalorder %s1125_s22, 1  ;;  %p135_p0 = scmp.eq.s32.totalorder %s685_s13, 1 }
  0x18   : > { %s1169_s21 = scalar_select %p27_p8, %s1064_s17, %s29_s19  }
  0x19   : > { %p1173_p12 = por %p43_p1, %p42_p10  ;;  %p1177_p13 = por %p129_p11, %p36_p7 }
  0x1a   : > { %p38_p2 = por %p37_p9, %p36_p7  ;;  %s195_s26 = sand.u32 1, %s1064_s17  }
  0x1b   : > { %p1182_p4 = por %p135_p0, %p42_p10  ;;  %p823_p6 = scmp.lt.s32.totalorder %s1068_s18, 2 }
  0x1c   : > { %s691_s28 = sshll.u32 %s195_s26, 3  ;;  %s692_s29 = sshll.u32 %s1068_s18, 3 }
  0x1d   : > { %s203_s6 = scalar_lea.hbm %s1280_s0, %s692_s29  ;;  %s199_s8 = scalar_lea.vmem [#allocation2], %s691_s28 }
  0x1e   : > { %s205_s7 = sshll.u32 %s203_s6, 4  ;;  %s207_s9 = sshll.u32 %s199_s8, 4  ;;  %s206_s7 = int_to_ptr.hbm [resolvable:$true] %s205_s7  ;;  %s208_s9 = int_to_ptr.vmem [resolvable:$true] %s207_s9 }
  0x1f   : > { %p1191_p8 = pnand %p823_p6, %p38_p2  ;;  %s196_s11 = scalar_lea.sflag [#allocation3], %s195_s26 }
  0x20   : > { %s964_s12 = sshra.s32 %s206_s7, 4  ;;  %s971_s28 = scalar_lea.hbm %s1280_s0, 16  ;;  %s965_s12 = int_to_ptr.hbm [resolvable:$true] %s964_s12 }
  0x21   : > { %s966_s13 = scalar_lea.hbm %s965_s12, 8  ;;  %p968_p9 = pneg %p1191_p8 }
  0x22   : > { %p967_p7 = scmp.ne.s32.totalorder %s965_s12, %s966_s13  ;;  %p972_p0 = scmp.lt.s32.totalorder %s965_s12, %s1280_s0 }
  0x23   : > { %p973_p2 = scmp.lt.s32.totalorder %s971_s28, %s966_s13 }
  0x24   : > { %p969_p10 = pnand %p968_p9, %p967_p7 }
  0x25   : > { %p974_p6 = por %p973_p2, %p972_p0 }
  0x26   : > { %p970_p11 = pneg %p969_p10 }
  0x28   : > { %p975_p5 = pnand %p974_p6, %p970_p11 }
  0x2a   : > { %978 = shalt.err (!%p975_p5)
}
  0x2b   : > { %815 = dma.hbm_to_vmem [thread:$0]  (!%p1191_p8), %s206_s7, 128, %s208_s9, %s196_s11  }
  0x2c   : > { %216 = sbr.rel (%p1130_p3) target bundleno = 991 (0x3df), region = 36  ;;  %s1208_s26 = sand.u32 (!%p1130_p3), 1, %s1060_s16  }
  0x2d   : > { %s694_s5 = sshll.u32 (!%p1130_p3), %s1208_s26, 3  ;;  %s219_s6 = scalar_lea.sflag (!%p1130_p3), [#allocation3], %s1208_s26 }
  0x2e   : > { %s222_s8 = scalar_lea.vmem (!%p1130_p3), [#allocation2], %s694_s5 }
  0x31   : > { %1039 = dma.done.wait (%p1173_p12), %s219_s6, 128  }
  0x32   : > { %1041 = vsyncadd (%p1173_p12), %s219_s6, 4294967168 }
  0x33   : > { %1043 = dma.done.wait (%p43_p1), [#allocation6], 2048  }
  0x34   : > { %1045 = vsyncadd (%p43_p1), [#allocation6], 4294965248 }
  0x35   : > { %1047 = dma.done.wait (%p43_p1), [#allocation9], 128  }
  0x36   : > { %1049 = vsyncadd (%p43_p1), [#allocation9], 4294967168  ;;  %v777_v0 = vld [vmem:[#allocation5 + $0x38] sm:$0xff]  ;;  %v776_v1 = vld [vmem:[#allocation5 + $0x30] sm:$0xff]  ;;  %v264_v40 = vlaneseq  ;;  %v1075_v55 = vmov 0.0   ;;  %s767_s23 = sshll.u32 %s1125_s22, 3 }
  0x37   : > { %336 = vmatpush.bf16.msra.mxu0 %v777_v0  ;;  %v775_v2 = vld [vmem:[#allocation5 + $0x28] sm:$0xff]  ;;  %v774_v3 = vld [vmem:[#allocation5 + $0x20] sm:$0xff]  ;;  %v773_v4 = vld [vmem:[#allocation5 + $0x18] sm:$0xff]  ;;  %s581_s9 = scalar_lea.hbm %s1284_s4, %s767_s23  ;;  %s262_s10 = scalar_lea.vmem [#allocation10], %s694_s5 }
  0x38   : > { %v772_v5 = vld [vmem:[#allocation5 + $0x10] sm:$0xff]  ;;  %v771_v6 = vld [vmem:[#allocation5 + $0x8] sm:$0xff]  ;;  %v770_v7 = vld [vmem:[#allocation5] sm:$0xff]  ;;  %v265_v48 = vand.u32 127, %v264_v40  ;;  %s583_s11 = sshll.u32 %s262_s10, 4  ;;  %s585_s12 = sshll.u32 %s581_s9, 4  ;;  %s584_s11 = int_to_ptr.vmem [resolvable:$true] %s583_s11  ;;  %s586_s12 = int_to_ptr.hbm [resolvable:$true] %s585_s12 }
  0x39   : > { %v1226_v8 = vld [vmem:[%s222_s8] sm:$0xff]  ;;  %v1230_v10 = vld [vmem:[#allocation8] sm:$0xff]  ;;  %s571_s22 = scalar_lea.sflag [#allocation4], %s1208_s26  ;;  %s1008_s13 = sshra.s32 %s586_s12, 4  ;;  %s1009_s13 = int_to_ptr.hbm [resolvable:$true] %s1008_s13 }
  0x3a   : > { %v270_v9 = vpack.c.bf16 %v1226_v8, %v1226_v8  ;;  %v287_v11 = vperm.slane %v1230_v10, 0  ;;  %vm266_vm4 = vcmp.lt.s32.totalorder %v265_v48, 32  ;;  %v785_v59 = vld [vmem:[#allocation7 + $0x38] sm:$0xff]  ;;  %s1010_s19 = scalar_lea.hbm %s1009_s13, 8  ;;  %s1014_s29 = scalar_lea.hbm %s1284_s4, 16 }
  0x3b   : > { %337 = vmatpush.bf16.msra.mxu0 %v776_v1  ;;  %v1233_v56 = vsel %vm266_vm4, 1.0, %v1075_v55  ;;  %485 = vmatpush.bf16.msra.mxu1 %v785_v59  ;;  %v784_v1 = vld [vmem:[#allocation7 + $0x30] sm:$0xff]  ;;  %p1011_p1 = scmp.ne.s32.totalorder %s1009_s13, %s1010_s19  ;;  %p1015_p12 = scmp.lt.s32.totalorder %s1009_s13, %s1284_s4 }
  0x3c   : > { %p1016_p8 = scmp.lt.s32.totalorder %s1014_s29, %s1010_s19 }
  0x3d   : > { %p1012_p3 = pnand %p1011_p1, %p1177_p13 }
  0x3e   : > { %p1017_p7 = por %p1016_p8, %p1015_p12 }
  0x3f   : > { %338 = vmatpush.bf16.msra.mxu0 %v775_v2  ;;  %486 = vmatpush.bf16.msra.mxu1 %v784_v1  ;;  %v783_v2 = vld [vmem:[#allocation7 + $0x28] sm:$0xff]  ;;  %p1013_p5 = pneg %p1012_p3 }
  0x41   : > { %p1018_p9 = pnand %p1017_p7, %p1013_p5 }
  0x43   : > { %339 = vmatpush.bf16.msra.mxu0 %v774_v3  ;;  %487 = vmatpush.bf16.msra.mxu1 %v783_v2  ;;  %v782_v3 = vld [vmem:[#allocation7 + $0x20] sm:$0xff] }
  0x47   : > { %340 = vmatpush.bf16.msra.mxu0 %v773_v4  ;;  %488 = vmatpush.bf16.msra.mxu1 %v782_v3  ;;  %v781_v4 = vld [vmem:[#allocation7 + $0x18] sm:$0xff] }
  0x4b   : > { %341 = vmatpush.bf16.msra.mxu0 %v772_v5  ;;  %489 = vmatpush.bf16.msra.mxu1 %v781_v4  ;;  %v780_v5 = vld [vmem:[#allocation7 + $0x10] sm:$0xff] }
  0x4f   : > { %342 = vmatpush.bf16.msra.mxu0 %v771_v6  ;;  %490 = vmatpush.bf16.msra.mxu1 %v780_v5  ;;  %v779_v6 = vld [vmem:[#allocation7 + $0x8] sm:$0xff] }
  0x53   : > { %343 = vmatpush.bf16.msra.mxu0 %v770_v7  ;;  %491 = vmatpush.bf16.msra.mxu1 %v779_v6  ;;  %v778_v7 = vld [vmem:[#allocation7] sm:$0xff] }
  0x56   : > { %344 = vmatmul.bf16.vlgmr.msra.gmra.mxu0 %v270_v9 }
  0x57   : > { %492 = vmatpush.bf16.msra.mxu1 %v778_v7 }
  0xd3   : > { %v345_v12 = vpop.f32.mrf.mxu0 }
  0xd4   : > { %v346_v13 = vadd.f32 %v345_v12, %v287_v11 }
  0xd6   : > { %v350_v14 = vmul.f32 0.70710677, %v346_v13  ;;  %v349_v53 = vmul.f32 0.5, %v346_v13 }
  0xd8   : > { %v351_v15 = vmul.f32 %v350_v14, %v350_v14 }
  0xda   : > { %v352_v16 = vmin.f32 %v351_v15, 16.0 }
  0xdb   : > { %v347_v17 = vpop.f32.mrf.mxu0 }
  0xdc   : > { %v353_v18 = vmul.f32 2.1237322e-06, %v352_v16  ;;  %v364_v19 = vmul.f32 3.8918573e-05, %v352_v16 }
  0xde   : > { %v354_v20 = vadd.f32 0.00028619796, %v353_v18  ;;  %v365_v21 = vadd.f32 0.001143296, %v364_v19  ;;  %v415_v19 = vperm.slane %v1230_v10, 1 }
  0xe0   : > { %v355_v22 = vmul.f32 %v354_v20, %v352_v16  ;;  %v366_v23 = vmul.f32 %v365_v21, %v352_v16 }
  0xe2   : > { %v367_v24 = vadd.f32 0.014752088, %v366_v23  ;;  %v356_v25 = vadd.f32 0.0036580483, %v355_v22  ;;  %v417_v22 = vperm.slane %v1230_v10, 2 }
  0xe4   : > { %v368_v26 = vmul.f32 %v367_v24, %v352_v16  ;;  %v357_v28 = vmul.f32 %v356_v25, %v352_v16 }
  0xe6   : > { %v369_v27 = vadd.f32 0.112945676, %v368_v26  ;;  %v358_v31 = vadd.f32 0.05243302, %v357_v28  ;;  %v436_v26 = vperm.slane %v1230_v10, 3 }
  0xe8   : > { %v370_v29 = vmul.f32 %v369_v27, %v352_v16  ;;  %v359_v34 = vmul.f32 %v358_v31, %v352_v16 }
  0xea   : > { %v371_v30 = vadd.f32 0.4994258, %v370_v29  ;;  %v360_v35 = vadd.f32 0.18741608, %v359_v34 }
  0xec   : > { %v372_v32 = vmul.f32 %v371_v30, %v352_v16  ;;  %v361_v37 = vmul.f32 %v360_v35, %v352_v16 }
  0xee   : > { %v373_v33 = vadd.f32 1.0, %v372_v32  ;;  %v362_v42 = vadd.f32 1.1283791, %v361_v37 }
  0xf0   : > { %866 = vrcp.f32 %v373_v33  ;;  %v385_v41 = vand.u32 2147483648, %v373_v33  ;;  %v383_v44 = vand.u32 2147483647, %v373_v33  ;;  %vm379_vm1 = vweird.f32 %v373_v33 }
  0xf1   : > { %v363_v47 = vmul.f32 %v362_v42, %v350_v14 }
  0xf2   : > { %v386_v46 = vor.u32 1.1754944e-38, %v385_v41  ;;  %vm384_vm3 = vcmp.eq.f32.partialorder %v383_v44, 8.507059e+37 }
  0xf6   : > { %v867_v36 = vpop.eup %866 }
  0xf7   : > { %v375_v38 = vmul.f32 %v867_v36, %v373_v33  ;;  %vm380_vm0 = vweird.f32 %v867_v36 }
  0xf8   : > { %vm381_vm2 = vmor %vm379_vm1, %vm380_vm0 }
  0xf9   : > { %v376_v39 = vsub.f32 1.0, %v375_v38 }
  0xfb   : > { %v377_v43 = vmul.f32 %v867_v36, %v376_v39 }
  0xfd   : > { %v378_v45 = vadd.f32 %v867_v36, %v377_v43 }
  0xff   : > { %v382_v49 = vsel %vm381_vm2, %v867_v36, %v378_v45 }
 0x100   : > { %v387_v50 = vsel %vm384_vm3, %v386_v46, %v382_v49 }
 0x101   : > { %v388_v51 = vmul.f32 %v387_v50, %v363_v47 }
 0x103   : > { %v732_v52 = vclamps-f32 %v388_v51, 1.0 }
 0x105   : > { %v391_v54 = vadd.f32 1.0, %v732_v52 }
 0x107   : > { %v392_v57 = vmul.f32 %v391_v54, %v349_v53 }
 0x109   : > { %v393_v58 = vmul.f32 %v1233_v56, %v392_v57 }
 0x10b   : > { %394 = vadd.xlane.f32.xlu0 %v393_v58 }
 0x17e   : > { %v395_v60 = vpop.xlane.xlu0 %394 }
 0x17f   : > { %v396_v61 = vmul.f32 0.03125, %v395_v60 }
 0x181   : > { %v397_v62 = vsub.f32 %v392_v57, %v396_v61 }
 0x183   : > { %v398_v63 = vmul.f32 %v397_v62, %v397_v62 }
 0x185   : > { %v399_v0 = vmul.f32 %v1233_v56, %v398_v63 }
 0x187   : > { %400 = vadd.xlane.f32.xlu0 %v399_v0 }
 0x1fa   : > { %v401_v9 = vpop.xlane.xlu0 %400 }
 0x1fb   : > { %v402_v11 = vmul.f32 0.03125, %v401_v9 }
 0x1fd   : > { %v403_v12 = vadd.f32 1e-05, %v402_v11 }
 0x1ff   : > { %868 = vrsqrt.f32 %v403_v12  ;;  %vm410_vm6 = vweird.f32 %v403_v12 }
 0x205   : > { %v869_v13 = vpop.eup %868 }
 0x206   : > { %v405_v14 = vmul.f32 %v869_v13, %v403_v12  ;;  %vm411_vm5 = vweird.f32 %v869_v13 }
 0x207   : > { %vm412_vm7 = vmor %vm410_vm6, %vm411_vm5 }
 0x208   : > { %v406_v15 = vmul.f32 %v869_v13, %v405_v14 }
 0x20a   : > { %v407_v16 = vmul.f32 0.5, %v406_v15 }
 0x20c   : > { %v408_v17 = vsub.f32 1.5, %v407_v16 }
 0x20e   : > { %v409_v18 = vmul.f32 %v869_v13, %v408_v17 }
 0x210   : > { %v413_v20 = vsel %vm412_vm7, %v869_v13, %v409_v18 }
 0x211   : > { %v414_v21 = vmul.f32 %v413_v20, %v397_v62 }
 0x213   : > { %v416_v23 = vmul.f32 %v415_v19, %v414_v21 }
 0x215   : > { %v418_v24 = vadd.f32 %v417_v22, %v416_v23  ;;  %v564_v23 = vperm.slane %v1230_v10, 4 }
 0x217   : > { %v419_v25 = vpack.c.bf16 %v418_v24, %v418_v24 }
 0x219   : > { %493 = vmatmul.bf16.vlgmr.msra.gmra.mxu1 %v419_v25  ;;  %v566_v25 = vperm.slane %v1230_v10, 5 }
 0x296   : > { %v494_v27 = vpop.f32.mrf.mxu1 }
 0x297   : > { %v495_v28 = vadd.f32 %v494_v27, %v436_v26 }
 0x299   : > { %v499_v29 = vmul.f32 0.70710677, %v495_v28  ;;  %v498_v3 = vmul.f32 0.5, %v495_v28 }
 0x29b   : > { %v500_v30 = vmul.f32 %v499_v29, %v499_v29 }
 0x29d   : > { %v501_v31 = vmin.f32 %v500_v30, 16.0 }
 0x29e   : > { %v496_v32 = vpop.f32.mrf.mxu1 }
 0x29f   : > { %v502_v33 = vmul.f32 2.1237322e-06, %v501_v31  ;;  %v513_v34 = vmul.f32 3.8918573e-05, %v501_v31 }
 0x2a1   : > { %v503_v35 = vadd.f32 0.00028619796, %v502_v33  ;;  %v514_v36 = vadd.f32 0.001143296, %v513_v34 }
 0x2a3   : > { %v504_v37 = vmul.f32 %v503_v35, %v501_v31  ;;  %v515_v38 = vmul.f32 %v514_v36, %v501_v31 }
 0x2a5   : > { %v516_v39 = vadd.f32 0.014752088, %v515_v38  ;;  %v505_v40 = vadd.f32 0.0036580483, %v504_v37 }
 0x2a7   : > { %v517_v41 = vmul.f32 %v516_v39, %v501_v31  ;;  %v506_v43 = vmul.f32 %v505_v40, %v501_v31 }
 0x2a9   : > { %v518_v42 = vadd.f32 0.112945676, %v517_v41  ;;  %v507_v46 = vadd.f32 0.05243302, %v506_v43 }
 0x2ab   : > { %v519_v44 = vmul.f32 %v518_v42, %v501_v31  ;;  %v508_v49 = vmul.f32 %v507_v46, %v501_v31 }
 0x2ad   : > { %v520_v45 = vadd.f32 0.4994258, %v519_v44  ;;  %v509_v50 = vadd.f32 0.18741608, %v508_v49 }
 0x2af   : > { %v521_v47 = vmul.f32 %v520_v45, %v501_v31  ;;  %v510_v52 = vmul.f32 %v509_v50, %v501_v31 }
 0x2b1   : > { %v522_v48 = vadd.f32 1.0, %v521_v47  ;;  %v511_v57 = vadd.f32 1.1283791, %v510_v52 }
 0x2b3   : > { %870 = vrcp.f32 %v522_v48  ;;  %v534_v55 = vand.u32 2147483648, %v522_v48  ;;  %v532_v59 = vand.u32 2147483647, %v522_v48  ;;  %vm528_vm9 = vweird.f32 %v522_v48 }
 0x2b4   : > { %v512_v62 = vmul.f32 %v511_v57, %v499_v29 }
 0x2b5   : > { %v535_v61 = vor.u32 1.1754944e-38, %v534_v55  ;;  %vm533_vm11 = vcmp.eq.f32.partialorder %v532_v59, 8.507059e+37 }
 0x2b9   : > { %v871_v51 = vpop.eup %870 }
 0x2ba   : > { %v524_v53 = vmul.f32 %v871_v51, %v522_v48  ;;  %vm529_vm8 = vweird.f32 %v871_v51 }
 0x2bb   : > { %vm530_vm10 = vmor %vm528_vm9, %vm529_vm8 }
 0x2bc   : > { %v525_v54 = vsub.f32 1.0, %v524_v53 }
 0x2be   : > { %v526_v58 = vmul.f32 %v871_v51, %v525_v54 }
 0x2c0   : > { %v527_v60 = vadd.f32 %v871_v51, %v526_v58 }
 0x2c2   : > { %v531_v63 = vsel %vm530_vm10, %v871_v51, %v527_v60 }
 0x2c3   : > { %v536_v0 = vsel %vm533_vm11, %v535_v61, %v531_v63 }
 0x2c4   : > { %v537_v1 = vmul.f32 %v536_v0, %v512_v62 }
 0x2c6   : > { %v765_v2 = vclamps-f32 %v537_v1, 1.0 }
 0x2c8   : > { %v540_v4 = vadd.f32 1.0, %v765_v2 }
 0x2ca   : > { %v541_v5 = vmul.f32 %v540_v4, %v498_v3 }
 0x2cc   : > { %v542_v6 = vmul.f32 %v1233_v56, %v541_v5 }
 0x2ce   : > { %543 = vadd.xlane.f32.xlu1 %v542_v6 }
 0x341   : > { %v544_v7 = vpop.xlane.xlu1 %543 }
 0x342   : > { %v545_v9 = vmul.f32 0.03125, %v544_v7 }
 0x344   : > { %v546_v11 = vsub.f32 %v541_v5, %v545_v9 }
 0x346   : > { %v547_v12 = vmul.f32 %v546_v11, %v546_v11 }
 0x348   : > { %v548_v13 = vmul.f32 %v1233_v56, %v547_v12 }
 0x34a   : > { %549 = vadd.xlane.f32.xlu1 %v548_v13 }
 0x3bd   : > { %v550_v14 = vpop.xlane.xlu1 %549 }
 0x3be   : > { %v551_v15 = vmul.f32 0.03125, %v550_v14 }
 0x3c0   : > { %v552_v16 = vadd.f32 1e-05, %v551_v15 }
 0x3c2   : > { %872 = vrsqrt.f32 %v552_v16  ;;  %vm559_vm13 = vweird.f32 %v552_v16 }
 0x3c8   : > { %v873_v17 = vpop.eup %872 }
 0x3c9   : > { %v554_v18 = vmul.f32 %v873_v17, %v552_v16  ;;  %vm560_vm12 = vweird.f32 %v873_v17 }
 0x3ca   : > { %vm561_vm14 = vmor %vm559_vm13, %vm560_vm12 }
 0x3cb   : > { %v555_v19 = vmul.f32 %v873_v17, %v554_v18 }
 0x3cd   : > { %v556_v20 = vmul.f32 0.5, %v555_v19 }
 0x3cf   : > { %v557_v21 = vsub.f32 1.5, %v556_v20 }
 0x3d1   : > { %v558_v22 = vmul.f32 %v873_v17, %v557_v21 }
 0x3d3   : > { %v562_v56 = vsel %vm561_vm14, %v873_v17, %v558_v22 }
 0x3d4   : > { %v563_v24 = vmul.f32 %v562_v56, %v546_v11 }
 0x3d6   : > { %v565_v26 = vmul.f32 %v564_v23, %v563_v24 }
 0x3d8   : > { %v567_v27 = vadd.f32 %v566_v25, %v565_v26 }
 0x3da   : > { %v568_v28 = vadd.f32 %v567_v27, %v1226_v8 }
 0x3dc   : > { %569 = vst [vmem:[%s262_s10] sm:$0xff] %v568_v28 }
 0x3dd   : > { %1021 = shalt.err (!%p1018_p9)
}
 0x3de   : > { %800 = dma.vmem_to_hbm [thread:$0]  (%p1177_p13), %s584_s11, 128, %s586_s12, %s571_s22  }
 0x3df PF: > { %s597_s26 = sand.u32 1, %s1056_s15   ;;  %p1291_p10 = scmp.ge.s32.totalorder %s1068_s18, 2 }
 0x3e0   : > { %s598_s6 = scalar_lea.sflag [#allocation4], %s597_s26 }
 0x3e1   : > { %p817_p11 = pnand %p1291_p10, %p1182_p4 }
 0x3e3   : > { %p818_p0 = pneg %p817_p11 }
 0x3e5   : > { %1051 = dma.done.wait (%p818_p0), %s598_s6, 128  }
 0x3e6   : > { %1053 = vsyncadd (%p818_p0), %s598_s6, 4294967168  ;;  %p19_p2 = scmp.ge.s32.totalorder %s1157_s14, 4   ;;  %s1292_s15 = smov %s1060_s16 }
 0x3e7   : > { %s1293_s16 = smov %s1064_s17  ;;  %s1294_s17 = smov %s1169_s21 }
 0x3e8   : > { %s1295_s18 = smov %s1157_s14  ;;  %21 = sbr.rel (!%p19_p2) target bundleno = 7 (0x7), region = 93 }
 0x3ed   :  { %604 = vsyncpa [#allocation3], 1 }
 0x3ee   :  { %606 = vsyncpa [#allocation3 + $0x1], 1 }
 0x3ef   :  { %607 = vsyncpa [#allocation6], 1 }
 0x3f0   :  { %608 = vsyncpa [#allocation9], 1 }
 0x3f1   :  { %609 = vsyncpa [#allocation4], 1 }
 0x3f2   :  { %611 = vsyncpa [#allocation4 + $0x1], 1 }

// kernel: tpu_custom_call.1
= control target key start
LH: loop header
LB: loop body
LE: loop exit
PB: predicated region body
PF: predicated region fallthrough
CT: control target
= control target key end

     0   :  { %9 = vsyncpa [#allocation3], 0  ;;  %s1280_s0 = inlined_call_operand.hbm [shape: f32[16,128], index: 0, kind: input, shape index: {}]   ;;  %s1281_s1 = inlined_call_operand.hbm [shape: bf16[128,128], index: 1, kind: input, shape index: {}]   ;;  %s1282_s2 = inlined_call_operand.hbm [shape: bf16[128,128], index: 2, kind: input, shape index: {}]   ;;  %s1283_s3 = inlined_call_operand.hbm [shape: f32[8,128], index: 3, kind: input, shape index: {}]   ;;  %s1284_s4 = inlined_call_operand.hbm [shape: f32[16,128], index: 4, kind: output, shape index: {}]  }
   0x1   :  { %11 = vsyncpa [#allocation3 + $0x1], 0 }
   0x2   :  { %12 = vsyncpa [#allocation6], 0 }
   0x3   :  { %13 = vsyncpa [#allocation9], 0 }
   0x4   :  { %14 = vsyncpa [#allocation4], 0 }
   0x5   :  { %16 = vsyncpa [#allocation4 + $0x1], 0  ;;  %s1101_s15 = smov 0   ;;  %s1103_s16 = smov 0  }
   0x6   :  { %s1105_s17 = smov 0   ;;  %s1107_s18 = smov 0  }
   0x7 LB: > { %s153_s21 = sshll.u32 %s1281_s1, 4  ;;  %s1125_s22 = sadd.s32 4294967295, %s1068_s18   ;;  %s1068_s18 = sphi %s1107_s18, %s1295_s18   ;;  %s1064_s17 = sphi %s1105_s17, %s1294_s17   ;;  %s1060_s16 = sphi %s1103_s16, %s1293_s16   ;;  %s1056_s15 = sphi %s1101_s15, %s1292_s15   ;;  %s154_s21 = int_to_ptr.hbm [resolvable:$true] %s153_s21 }
   0x8   : > { %p686_p0 = scmp.ge.s32.totalorder %s1068_s18, 1  ;;  %p43_p1 = scmp.eq.s32.totalorder %s1125_s22, 0 }
   0x9   : > { %p142_p2 = scmp.lt.s32.totalorder %s1068_s18, 3  ;;  %s1070_s24 = smov [#allocation5]  }
   0xa   : > { %s155_s25 = sshll.u32 %s1070_s24, 4  ;;  %s167_s28 = sshll.u32 %s1282_s2, 4  ;;  %s156_s25 = int_to_ptr.vmem [resolvable:$true] %s155_s25  ;;  %s168_s28 = int_to_ptr.hbm [resolvable:$true] %s167_s28 }
   0xb   : > { %p1130_p3 = pnand %p686_p0, %p142_p2  ;;  %s182_s6 = sshll.u32 %s1283_s3, 4  ;;  %s183_s6 = int_to_ptr.hbm [resolvable:$true] %s182_s6 }
   0xc   : > { %s1071_s7 = smov [#allocation7]   ;;  %s1072_s9 = smov 64  }
   0xd   : > { %p802_p4 = pneg %p1130_p3  ;;  %s169_s8 = sshll.u32 %s1071_s7, 4  ;;  %s170_s8 = int_to_ptr.vmem [resolvable:$true] %s169_s8 }
   0xe   : > { %s1073_s10 = smov 4   ;;  %s1074_s11 = smov [#allocation8]  }
   0xf   : > { %p1142_p6 = pnand %p802_p4, %p43_p1  ;;  %s184_s12 = sshll.u32 %s1074_s11, 4  ;;  %s185_s12 = int_to_ptr.vmem [resolvable:$true] %s184_s12 }
  0x10   : > { %s685_s13 = sadd.s32 4294967294, %s1068_s18   ;;  %s1157_s14 = sadd.s32 1, %s1068_s18  }
  0x11   : > { %805 = dma.hbm_to_vmem [thread:$0]  (!%p1142_p6), %s154_s21, 1024, %s156_s25, [#allocation6], %s1072_s9, %s1072_s9, %s1073_s10  }
  0x12   : > { %808 = dma.hbm_to_vmem [thread:$0]  (!%p1142_p6), %s168_s28, 1024, %s170_s8, [#allocation6], %s1072_s9, %s1072_s9, %s1073_s10  }
  0x13   : > { %811 = dma.hbm_to_vmem [thread:$0]  (!%p1142_p6), %s183_s6, 128, %s185_s12, [#allocation9]  }
  0x14   : > { %s29_s19 = sadd.s32 1, %s1064_s17  ;;  %s26_s20 = ssub.s32 %s1068_s18, %s1157_s14 }
  0x15   : > { %p36_p7 = scmp.ne.s32.totalorder %s1064_s17, %s1060_s16  ;;  %p27_p8 = scmp.eq.s32.totalorder %s26_s20, 0 }
  0x16   : > { %p37_p9 = scmp.eq.s32.totalorder %s1068_s18, 0  ;;  %p42_p10 = scmp.ne.s32.totalorder %s1060_s16, %s1056_s15 }
  0x17   : > { %p129_p11 = scmp.eq.s32.totalorder %s1125_s22, 1  ;;  %p135_p0 = scmp.eq.s32.totalorder %s685_s13, 1 }
  0x18   : > { %s1169_s21 = scalar_select %p27_p8, %s1064_s17, %s29_s19  }
  0x19   : > { %p1173_p12 = por %p43_p1, %p42_p10  ;;  %p1177_p13 = por %p129_p11, %p36_p7 }
  0x1a   : > { %p38_p2 = por %p37_p9, %p36_p7  ;;  %s195_s26 = sand.u32 1, %s1064_s17  }
  0x1b   : > { %p1182_p4 = por %p135_p0, %p42_p10  ;;  %p823_p6 = scmp.lt.s32.totalorder %s1068_s18, 2 }
  0x1c   : > { %s691_s28 = sshll.u32 %s195_s26, 3  ;;  %s692_s29 = sshll.u32 %s1068_s18, 3 }
  0x1d   : > { %s203_s6 = scalar_lea.hbm %s1280_s0, %s692_s29  ;;  %s199_s8 = scalar_lea.vmem [#allocation2], %s691_s28 }
  0x1e   : > { %s205_s7 = sshll.u32 %s203_s6, 4  ;;  %s207_s9 = sshll.u32 %s199_s8, 4  ;;  %s206_s7 = int_to_ptr.hbm [resolvable:$true] %s205_s7  ;;  %s208_s9 = int_to_ptr.vmem [resolvable:$true] %s207_s9 }
  0x1f   : > { %p1191_p8 = pnand %p823_p6, %p38_p2  ;;  %s196_s11 = scalar_lea.sflag [#allocation3], %s195_s26 }
  0x20   : > { %s964_s12 = sshra.s32 %s206_s7, 4  ;;  %s971_s28 = scalar_lea.hbm %s1280_s0, 16  ;;  %s965_s12 = int_to_ptr.hbm [resolvable:$true] %s964_s12 }
  0x21   : > { %s966_s13 = scalar_lea.hbm %s965_s12, 8  ;;  %p968_p9 = pneg %p1191_p8 }
  0x22   : > { %p967_p7 = scmp.ne.s32.totalorder %s965_s12, %s966_s13  ;;  %p972_p0 = scmp.lt.s32.totalorder %s965_s12, %s1280_s0 }
  0x23   : > { %p973_p2 = scmp.lt.s32.totalorder %s971_s28, %s966_s13 }
  0x24   : > { %p969_p10 = pnand %p968_p9, %p967_p7 }
  0x25   : > { %p974_p6 = por %p973_p2, %p972_p0 }
  0x26   : > { %p970_p11 = pneg %p969_p10 }
  0x28   : > { %p975_p5 = pnand %p974_p6, %p970_p11 }
  0x2a   : > { %978 = shalt.err (!%p975_p5)
}
  0x2b   : > { %815 = dma.hbm_to_vmem [thread:$0]  (!%p1191_p8), %s206_s7, 128, %s208_s9, %s196_s11  }
  0x2c   : > { %216 = sbr.rel (%p1130_p3) target bundleno = 991 (0x3df), region = 36  ;;  %s1208_s26 = sand.u32 (!%p1130_p3), 1, %s1060_s16  }
  0x2d   : > { %s694_s5 = sshll.u32 (!%p1130_p3), %s1208_s26, 3  ;;  %s219_s6 = scalar_lea.sflag (!%p1130_p3), [#allocation3], %s1208_s26 }
  0x2e   : > { %s222_s8 = scalar_lea.vmem (!%p1130_p3), [#allocation2], %s694_s5 }
  0x31   : > { %1039 = dma.done.wait (%p1173_p12), %s219_s6, 128  }
  0x32   : > { %1041 = vsyncadd (%p1173_p12), %s219_s6, 4294967168 }
  0x33   : > { %1043 = dma.done.wait (%p43_p1), [#allocation6], 2048  }
  0x34   : > { %1045 = vsyncadd (%p43_p1), [#allocation6], 4294965248 }
  0x35   : > { %1047 = dma.done.wait (%p43_p1), [#allocation9], 128  }
  0x36   : > { %1049 = vsyncadd (%p43_p1), [#allocation9], 4294967168  ;;  %v777_v0 = vld [vmem:[#allocation5 + $0x38] sm:$0xff]  ;;  %v776_v1 = vld [vmem:[#allocation5 + $0x30] sm:$0xff]  ;;  %v264_v40 = vlaneseq  ;;  %v1075_v55 = vmov 0.0   ;;  %s767_s23 = sshll.u32 %s1125_s22, 3 }
  0x37   : > { %336 = vmatpush.bf16.msra.mxu0 %v777_v0  ;;  %v775_v2 = vld [vmem:[#allocation5 + $0x28] sm:$0xff]  ;;  %v774_v3 = vld [vmem:[#allocation5 + $0x20] sm:$0xff]  ;;  %v773_v4 = vld [vmem:[#allocation5 + $0x18] sm:$0xff]  ;;  %s581_s9 = scalar_lea.hbm %s1284_s4, %s767_s23  ;;  %s262_s10 = scalar_lea.vmem [#allocation10], %s694_s5 }
  0x38   : > { %v772_v5 = vld [vmem:[#allocation5 + $0x10] sm:$0xff]  ;;  %v771_v6 = vld [vmem:[#allocation5 + $0x8] sm:$0xff]  ;;  %v770_v7 = vld [vmem:[#allocation5] sm:$0xff]  ;;  %v265_v48 = vand.u32 127, %v264_v40  ;;  %s583_s11 = sshll.u32 %s262_s10, 4  ;;  %s585_s12 = sshll.u32 %s581_s9, 4  ;;  %s584_s11 = int_to_ptr.vmem [resolvable:$true] %s583_s11  ;;  %s586_s12 = int_to_ptr.hbm [resolvable:$true] %s585_s12 }
  0x39   : > { %v1226_v8 = vld [vmem:[%s222_s8] sm:$0xff]  ;;  %v1230_v10 = vld [vmem:[#allocation8] sm:$0xff]  ;;  %s571_s22 = scalar_lea.sflag [#allocation4], %s1208_s26  ;;  %s1008_s13 = sshra.s32 %s586_s12, 4  ;;  %s1009_s13 = int_to_ptr.hbm [resolvable:$true] %s1008_s13 }
  0x3a   : > { %v270_v9 = vpack.c.bf16 %v1226_v8, %v1226_v8  ;;  %v287_v11 = vperm.slane %v1230_v10, 0  ;;  %vm266_vm4 = vcmp.lt.s32.totalorder %v265_v48, 32  ;;  %v785_v59 = vld [vmem:[#allocation7 + $0x38] sm:$0xff]  ;;  %s1010_s19 = scalar_lea.hbm %s1009_s13, 8  ;;  %s1014_s29 = scalar_lea.hbm %s1284_s4, 16 }
  0x3b   : > { %337 = vmatpush.bf16.msra.mxu0 %v776_v1  ;;  %v1233_v56 = vsel %vm266_vm4, 1.0, %v1075_v55  ;;  %485 = vmatpush.bf16.msra.mxu1 %v785_v59  ;;  %v784_v1 = vld [vmem:[#allocation7 + $0x30] sm:$0xff]  ;;  %p1011_p1 = scmp.ne.s32.totalorder %s1009_s13, %s1010_s19  ;;  %p1015_p12 = scmp.lt.s32.totalorder %s1009_s13, %s1284_s4 }
  0x3c   : > { %p1016_p8 = scmp.lt.s32.totalorder %s1014_s29, %s1010_s19 }
  0x3d   : > { %p1012_p3 = pnand %p1011_p1, %p1177_p13 }
  0x3e   : > { %p1017_p7 = por %p1016_p8, %p1015_p12 }
  0x3f   : > { %338 = vmatpush.bf16.msra.mxu0 %v775_v2  ;;  %486 = vmatpush.bf16.msra.mxu1 %v784_v1  ;;  %v783_v2 = vld [vmem:[#allocation7 + $0x28] sm:$0xff]  ;;  %p1013_p5 = pneg %p1012_p3 }
  0x41   : > { %p1018_p9 = pnand %p1017_p7, %p1013_p5 }
  0x43   : > { %339 = vmatpush.bf16.msra.mxu0 %v774_v3  ;;  %487 = vmatpush.bf16.msra.mxu1 %v783_v2  ;;  %v782_v3 = vld [vmem:[#allocation7 + $0x20] sm:$0xff] }
  0x47   : > { %340 = vmatpush.bf16.msra.mxu0 %v773_v4  ;;  %488 = vmatpush.bf16.msra.mxu1 %v782_v3  ;;  %v781_v4 = vld [vmem:[#allocation7 + $0x18] sm:$0xff] }
  0x4b   : > { %341 = vmatpush.bf16.msra.mxu0 %v772_v5  ;;  %489 = vmatpush.bf16.msra.mxu1 %v781_v4  ;;  %v780_v5 = vld [vmem:[#allocation7 + $0x10] sm:$0xff] }
  0x4f   : > { %342 = vmatpush.bf16.msra.mxu0 %v771_v6  ;;  %490 = vmatpush.bf16.msra.mxu1 %v780_v5  ;;  %v779_v6 = vld [vmem:[#allocation7 + $0x8] sm:$0xff] }
  0x53   : > { %343 = vmatpush.bf16.msra.mxu0 %v770_v7  ;;  %491 = vmatpush.bf16.msra.mxu1 %v779_v6  ;;  %v778_v7 = vld [vmem:[#allocation7] sm:$0xff] }
  0x56   : > { %344 = vmatmul.bf16.vlgmr.msra.gmra.mxu0 %v270_v9 }
  0x57   : > { %492 = vmatpush.bf16.msra.mxu1 %v778_v7 }
  0xd3   : > { %v345_v12 = vpop.f32.mrf.mxu0 }
  0xd4   : > { %v346_v13 = vadd.f32 %v345_v12, %v287_v11 }
  0xd6   : > { %v350_v14 = vmul.f32 0.70710677, %v346_v13  ;;  %v349_v53 = vmul.f32 0.5, %v346_v13 }
  0xd8   : > { %v351_v15 = vmul.f32 %v350_v14, %v350_v14 }
  0xda   : > { %v352_v16 = vmin.f32 %v351_v15, 16.0 }
  0xdb   : > { %v347_v17 = vpop.f32.mrf.mxu0 }
  0xdc   : > { %v353_v18 = vmul.f32 2.1237322e-06, %v352_v16  ;;  %v364_v19 = vmul.f32 3.8918573e-05, %v352_v16 }
  0xde   : > { %v354_v20 = vadd.f32 0.00028619796, %v353_v18  ;;  %v365_v21 = vadd.f32 0.001143296, %v364_v19  ;;  %v415_v19 = vperm.slane %v1230_v10, 1 }
  0xe0   : > { %v355_v22 = vmul.f32 %v354_v20, %v352_v16  ;;  %v366_v23 = vmul.f32 %v365_v21, %v352_v16 }
  0xe2   : > { %v367_v24 = vadd.f32 0.014752088, %v366_v23  ;;  %v356_v25 = vadd.f32 0.0036580483, %v355_v22  ;;  %v417_v22 = vperm.slane %v1230_v10, 2 }
  0xe4   : > { %v368_v26 = vmul.f32 %v367_v24, %v352_v16  ;;  %v357_v28 = vmul.f32 %v356_v25, %v352_v16 }
  0xe6   : > { %v369_v27 = vadd.f32 0.112945676, %v368_v26  ;;  %v358_v31 = vadd.f32 0.05243302, %v357_v28  ;;  %v436_v26 = vperm.slane %v1230_v10, 3 }
  0xe8   : > { %v370_v29 = vmul.f32 %v369_v27, %v352_v16  ;;  %v359_v34 = vmul.f32 %v358_v31, %v352_v16 }
  0xea   : > { %v371_v30 = vadd.f32 0.4994258, %v370_v29  ;;  %v360_v35 = vadd.f32 0.18741608, %v359_v34 }
  0xec   : > { %v372_v32 = vmul.f32 %v371_v30, %v352_v16  ;;  %v361_v37 = vmul.f32 %v360_v35, %v352_v16 }
  0xee   : > { %v373_v33 = vadd.f32 1.0, %v372_v32  ;;  %v362_v42 = vadd.f32 1.1283791, %v361_v37 }
  0xf0   : > { %866 = vrcp.f32 %v373_v33  ;;  %v385_v41 = vand.u32 2147483648, %v373_v33  ;;  %v383_v44 = vand.u32 2147483647, %v373_v33  ;;  %vm379_vm1 = vweird.f32 %v373_v33 }
  0xf1   : > { %v363_v47 = vmul.f32 %v362_v42, %v350_v14 }
  0xf2   : > { %v386_v46 = vor.u32 1.1754944e-38, %v385_v41  ;;  %vm384_vm3 = vcmp.eq.f32.partialorder %v383_v44, 8.507059e+37 }
  0xf6   : > { %v867_v36 = vpop.eup %866 }
  0xf7   : > { %v375_v38 = vmul.f32 %v867_v36, %v373_v33  ;;  %vm380_vm0 = vweird.f32 %v867_v36 }
  0xf8   : > { %vm381_vm2 = vmor %vm379_vm1, %vm380_vm0 }
  0xf9   : > { %v376_v39 = vsub.f32 1.0, %v375_v38 }
  0xfb   : > { %v377_v43 = vmul.f32 %v867_v36, %v376_v39 }
  0xfd   : > { %v378_v45 = vadd.f32 %v867_v36, %v377_v43 }
  0xff   : > { %v382_v49 = vsel %vm381_vm2, %v867_v36, %v378_v45 }
 0x100   : > { %v387_v50 = vsel %vm384_vm3, %v386_v46, %v382_v49 }
 0x101   : > { %v388_v51 = vmul.f32 %v387_v50, %v363_v47 }
 0x103   : > { %v732_v52 = vclamps-f32 %v388_v51, 1.0 }
 0x105   : > { %v391_v54 = vadd.f32 1.0, %v732_v52 }
 0x107   : > { %v392_v57 = vmul.f32 %v391_v54, %v349_v53 }
 0x109   : > { %v393_v58 = vmul.f32 %v1233_v56, %v392_v57 }
 0x10b   : > { %394 = vadd.xlane.f32.xlu0 %v393_v58 }
 0x17e   : > { %v395_v60 = vpop.xlane.xlu0 %394 }
 0x17f   : > { %v396_v61 = vmul.f32 0.03125, %v395_v60 }
 0x181   : > { %v397_v62 = vsub.f32 %v392_v57, %v396_v61 }
 0x183   : > { %v398_v63 = vmul.f32 %v397_v62, %v397_v62 }
 0x185   : > { %v399_v0 = vmul.f32 %v1233_v56, %v398_v63 }
 0x187   : > { %400 = vadd.xlane.f32.xlu0 %v399_v0 }
 0x1fa   : > { %v401_v9 = vpop.xlane.xlu0 %400 }
 0x1fb   : > { %v402_v11 = vmul.f32 0.03125, %v401_v9 }
 0x1fd   : > { %v403_v12 = vadd.f32 1e-05, %v402_v11 }
 0x1ff   : > { %868 = vrsqrt.f32 %v403_v12  ;;  %vm410_vm6 = vweird.f32 %v403_v12 }
 0x205   : > { %v869_v13 = vpop.eup %868 }
 0x206   : > { %v405_v14 = vmul.f32 %v869_v13, %v403_v12  ;;  %vm411_vm5 = vweird.f32 %v869_v13 }
 0x207   : > { %vm412_vm7 = vmor %vm410_vm6, %vm411_vm5 }
 0x208   : > { %v406_v15 = vmul.f32 %v869_v13, %v405_v14 }
 0x20a   : > { %v407_v16 = vmul.f32 0.5, %v406_v15 }
 0x20c   : > { %v408_v17 = vsub.f32 1.5, %v407_v16 }
 0x20e   : > { %v409_v18 = vmul.f32 %v869_v13, %v408_v17 }
 0x210   : > { %v413_v20 = vsel %vm412_vm7, %v869_v13, %v409_v18 }
 0x211   : > { %v414_v21 = vmul.f32 %v413_v20, %v397_v62 }
 0x213   : > { %v416_v23 = vmul.f32 %v415_v19, %v414_v21 }
 0x215   : > { %v418_v24 = vadd.f32 %v417_v22, %v416_v23  ;;  %v564_v23 = vperm.slane %v1230_v10, 4 }
 0x217   : > { %v419_v25 = vpack.c.bf16 %v418_v24, %v418_v24 }
 0x219   : > { %493 = vmatmul.bf16.vlgmr.msra.gmra.mxu1 %v419_v25  ;;  %v566_v25 = vperm.slane %v1230_v10, 5 }
 0x296   : > { %v494_v27 = vpop.f32.mrf.mxu1 }
 0x297   : > { %v495_v28 = vadd.f32 %v494_v27, %v436_v26 }
 0x299   : > { %v499_v29 = vmul.f32 0.70710677, %v495_v28  ;;  %v498_v3 = vmul.f32 0.5, %v495_v28 }
 0x29b   : > { %v500_v30 = vmul.f32 %v499_v29, %v499_v29 }
 0x29d   : > { %v501_v31 = vmin.f32 %v500_v30, 16.0 }
 0x29e   : > { %v496_v32 = vpop.f32.mrf.mxu1 }
 0x29f   : > { %v502_v33 = vmul.f32 2.1237322e-06, %v501_v31  ;;  %v513_v34 = vmul.f32 3.8918573e-05, %v501_v31 }
 0x2a1   : > { %v503_v35 = vadd.f32 0.00028619796, %v502_v33  ;;  %v514_v36 = vadd.f32 0.001143296, %v513_v34 }
 0x2a3   : > { %v504_v37 = vmul.f32 %v503_v35, %v501_v31  ;;  %v515_v38 = vmul.f32 %v514_v36, %v501_v31 }
 0x2a5   : > { %v516_v39 = vadd.f32 0.014752088, %v515_v38  ;;  %v505_v40 = vadd.f32 0.0036580483, %v504_v37 }
 0x2a7   : > { %v517_v41 = vmul.f32 %v516_v39, %v501_v31  ;;  %v506_v43 = vmul.f32 %v505_v40, %v501_v31 }
 0x2a9   : > { %v518_v42 = vadd.f32 0.112945676, %v517_v41  ;;  %v507_v46 = vadd.f32 0.05243302, %v506_v43 }
 0x2ab   : > { %v519_v44 = vmul.f32 %v518_v42, %v501_v31  ;;  %v508_v49 = vmul.f32 %v507_v46, %v501_v31 }
 0x2ad   : > { %v520_v45 = vadd.f32 0.4994258, %v519_v44  ;;  %v509_v50 = vadd.f32 0.18741608, %v508_v49 }
 0x2af   : > { %v521_v47 = vmul.f32 %v520_v45, %v501_v31  ;;  %v510_v52 = vmul.f32 %v509_v50, %v501_v31 }
 0x2b1   : > { %v522_v48 = vadd.f32 1.0, %v521_v47  ;;  %v511_v57 = vadd.f32 1.1283791, %v510_v52 }
 0x2b3   : > { %870 = vrcp.f32 %v522_v48  ;;  %v534_v55 = vand.u32 2147483648, %v522_v48  ;;  %v532_v59 = vand.u32 2147483647, %v522_v48  ;;  %vm528_vm9 = vweird.f32 %v522_v48 }
 0x2b4   : > { %v512_v62 = vmul.f32 %v511_v57, %v499_v29 }
 0x2b5   : > { %v535_v61 = vor.u32 1.1754944e-38, %v534_v55  ;;  %vm533_vm11 = vcmp.eq.f32.partialorder %v532_v59, 8.507059e+37 }
 0x2b9   : > { %v871_v51 = vpop.eup %870 }
 0x2ba   : > { %v524_v53 = vmul.f32 %v871_v51, %v522_v48  ;;  %vm529_vm8 = vweird.f32 %v871_v51 }
 0x2bb   : > { %vm530_vm10 = vmor %vm528_vm9, %vm529_vm8 }
 0x2bc   : > { %v525_v54 = vsub.f32 1.0, %v524_v53 }
 0x2be   : > { %v526_v58 = vmul.f32 %v871_v51, %v525_v54 }
 0x2c0   : > { %v527_v60 = vadd.f32 %v871_v51, %v526_v58 }
 0x2c2   : > { %v531_v63 = vsel %vm530_vm10, %v871_v51, %v527_v60 }
 0x2c3   : > { %v536_v0 = vsel %vm533_vm11, %v535_v61, %v531_v63 }
 0x2c4   : > { %v537_v1 = vmul.f32 %v536_v0, %v512_v62 }
 0x2c6   : > { %v765_v2 = vclamps-f32 %v537_v1, 1.0 }
 0x2c8   : > { %v540_v4 = vadd.f32 1.0, %v765_v2 }
 0x2ca   : > { %v541_v5 = vmul.f32 %v540_v4, %v498_v3 }
 0x2cc   : > { %v542_v6 = vmul.f32 %v1233_v56, %v541_v5 }
 0x2ce   : > { %543 = vadd.xlane.f32.xlu1 %v542_v6 }
 0x341   : > { %v544_v7 = vpop.xlane.xlu1 %543 }
 0x342   : > { %v545_v9 = vmul.f32 0.03125, %v544_v7 }
 0x344   : > { %v546_v11 = vsub.f32 %v541_v5, %v545_v9 }
 0x346   : > { %v547_v12 = vmul.f32 %v546_v11, %v546_v11 }
 0x348   : > { %v548_v13 = vmul.f32 %v1233_v56, %v547_v12 }
 0x34a   : > { %549 = vadd.xlane.f32.xlu1 %v548_v13 }
 0x3bd   : > { %v550_v14 = vpop.xlane.xlu1 %549 }
 0x3be   : > { %v551_v15 = vmul.f32 0.03125, %v550_v14 }
 0x3c0   : > { %v552_v16 = vadd.f32 1e-05, %v551_v15 }
 0x3c2   : > { %872 = vrsqrt.f32 %v552_v16  ;;  %vm559_vm13 = vweird.f32 %v552_v16 }
 0x3c8   : > { %v873_v17 = vpop.eup %872 }
 0x3c9   : > { %v554_v18 = vmul.f32 %v873_v17, %v552_v16  ;;  %vm560_vm12 = vweird.f32 %v873_v17 }
 0x3ca   : > { %vm561_vm14 = vmor %vm559_vm13, %vm560_vm12 }
 0x3cb   : > { %v555_v19 = vmul.f32 %v873_v17, %v554_v18 }
 0x3cd   : > { %v556_v20 = vmul.f32 0.5, %v555_v19 }
 0x3cf   : > { %v557_v21 = vsub.f32 1.5, %v556_v20 }
 0x3d1   : > { %v558_v22 = vmul.f32 %v873_v17, %v557_v21 }
 0x3d3   : > { %v562_v56 = vsel %vm561_vm14, %v873_v17, %v558_v22 }
 0x3d4   : > { %v563_v24 = vmul.f32 %v562_v56, %v546_v11 }
 0x3d6   : > { %v565_v26 = vmul.f32 %v564_v23, %v563_v24 }
 0x3d8   : > { %v567_v27 = vadd.f32 %v566_v25, %v565_v26 }
 0x3da   : > { %v568_v28 = vadd.f32 %v567_v27, %v1226_v8 }
 0x3dc   : > { %569 = vst [vmem:[%s262_s10] sm:$0xff] %v568_v28 }
 0x3dd   : > { %1021 = shalt.err (!%p1018_p9)
}
 0x3de   : > { %800 = dma.vmem_to_hbm [thread:$0]  (%p1177_p13), %s584_s11, 128, %s586_s12, %s571_s22  }
 0x3df PF: > { %s597_s26 = sand.u32 1, %s1056_s15   ;;  %p1291_p10 = scmp.ge.s32.totalorder %s1068_s18, 2 }
 0x3e0   : > { %s598_s6 = scalar_lea.sflag [#allocation4], %s597_s26 }
 0x3e1   : > { %p817_p11 = pnand %p1291_p10, %p1182_p4 }
 0x3e3   : > { %p818_p0 = pneg %p817_p11 }
 0x3e5   : > { %1051 = dma.done.wait (%p818_p0), %s598_s6, 128  }
 0x3e6   : > { %1053 = vsyncadd (%p818_p0), %s598_s6, 4294967168  ;;  %p19_p2 = scmp.ge.s32.totalorder %s1157_s14, 4   ;;  %s1292_s15 = smov %s1060_s16 }
 0x3e7   : > { %s1293_s16 = smov %s1064_s17  ;;  %s1294_s17 = smov %s1169_s21 }
 0x3e8   : > { %s1295_s18 = smov %s1157_s14  ;;  %21 = sbr.rel (!%p19_p2) target bundleno = 7 (0x7), region = 93 }
 0x3ed   :  { %604 = vsyncpa [#allocation3], 1 }
 0x3ee   :  { %606 = vsyncpa [#allocation3 + $0x1], 1 }
 0x3ef   :  { %607 = vsyncpa [#allocation6], 1 }
 0x3f0   :  { %608 = vsyncpa [#allocation9], 1 }
 0x3f1   :  { %609 = vsyncpa [#allocation4], 1 }
 0x3f2   :  { %611 = vsyncpa [#allocation4 + $0x1], 1 }

</bundles_post_ra>
